<compile_context>
chip_gen: v7x
topology: tpu7x:2x2x1
jax: 0.10.0
libtpu: 0.0.40
codegen_flags: <defaults>
</compile_context>

<pallas_src>
import jax
import jax.numpy as jnp
from jax.experimental import pallas as pl
from jax.experimental.pallas import tpu as pltpu


def mlp_kernel(x_ref, w1_ref, b1_ref, w2_ref, b2_ref, w3_ref, b3_ref, o_ref):
    # In-kernel cast of the streamed x tile to bf16; all dots accumulate f32.
    x = x_ref[...].astype(jnp.bfloat16)

    # fc1 + bias + ReLU (bias/ReLU in f32)
    h1 = jnp.dot(x, w1_ref[...], preferred_element_type=jnp.float32) + b1_ref[...]
    h1 = jnp.maximum(h1, 0.0)

    # fc2 + bias + ReLU
    h2 = jnp.dot(h1.astype(jnp.bfloat16), w2_ref[...],
                 preferred_element_type=jnp.float32) + b2_ref[...]
    h2 = jnp.maximum(h2, 0.0)

    # fc3 straight into the un-padded (tb, 2) output block.
    o_ref[...] = jnp.dot(h2.astype(jnp.bfloat16), w3_ref[...],
                         preferred_element_type=jnp.float32) + b3_ref[...]


def _round_up(x, m):
    return ((x + m - 1) // m) * m


def _choose_batch_tile(batch, tb_max):
    """Snug batch tiling; >=2 blocks once batch >= 256 so v7x can shard TCs."""
    if batch < 256:
        return _round_up(batch, 8), 1
    nblocks = max(2, pl.cdiv(batch, tb_max))
    tb = _round_up(pl.cdiv(batch, nblocks), 8)
    return tb, pl.cdiv(batch, tb)


def prepare_params(params):
    """One-time param prep: bf16 matmul weights, f32 biases (row vectors)."""
    w1, b1, w2, b2, w3, b3 = params
    return (w1.astype(jnp.bfloat16), b1.reshape(1, -1).astype(jnp.float32),
            w2.astype(jnp.bfloat16), b2.reshape(1, -1).astype(jnp.float32),
            w3.astype(jnp.bfloat16), b3.reshape(1, -1).astype(jnp.float32))


def net_forward(x, prepared_params, *, tb_max=2048):
    """Full 3-layer MLP in a single fused Pallas call, tiled over the batch."""
    w1, b1, w2, b2, w3, b3 = prepared_params
    batch, in_dim = x.shape
    h1_dim = w1.shape[1]   # 128
    h2_dim = w2.shape[1]   # 64
    out_dim = w3.shape[1]  # 2

    tb, nblocks = _choose_batch_tile(batch, tb_max)
    grid = (nblocks,)

    # --- honest advisory cost estimate for XLA scheduling ---
    flops = 2 * batch * (in_dim * h1_dim + h1_dim * h2_dim + h2_dim * out_dim)
    bytes_accessed = (batch * in_dim * x.dtype.itemsize
                      + batch * out_dim * 4
                      + (w1.size + w2.size + w3.size) * 2
                      + (b1.size + b2.size + b3.size) * 4)

    def resident(a):  # grid-invariant block -> stays VMEM-resident across steps
        return pl.BlockSpec(a.shape, lambda i: (0, 0))

    return pl.pallas_call(
        mlp_kernel,
        out_shape=jax.ShapeDtypeStruct((batch, out_dim), jnp.float32),
        grid=grid,
        in_specs=[
            pl.BlockSpec((tb, in_dim), lambda i: (i, 0)),   # streamed x tiles
            resident(w1), resident(b1),
            resident(w2), resident(b2),
            resident(w3), resident(b3),
        ],
        out_specs=pl.BlockSpec((tb, out_dim), lambda i: (i, 0)),
        compiler_params=pltpu.CompilerParams(
            dimension_semantics=("parallel",)),
        cost_estimate=pl.CostEstimate(
            flops=flops, transcendentals=0, bytes_accessed=bytes_accessed),
    )(x, w1, b1, w2, b2, w3, b3)


def init_params(key, input_size):
    """nn.Linear-style init; weights stored transposed: (in_features, out_features)."""
    ks = jax.random.split(key, 6)

    def lin(kw, kb, fan_in, fan_out):
        bound = 1.0 / jnp.sqrt(fan_in)
        w = jax.random.uniform(kw, (fan_in, fan_out), jnp.float32, -bound, bound)
        b = jax.random.uniform(kb, (1, fan_out), jnp.float32, -bound, bound)
        return w, b

    w1, b1 = lin(ks[0], ks[1], input_size, 128)
    w2, b2 = lin(ks[2], ks[3], 128, 64)
    w3, b3 = lin(ks[4], ks[5], 64, 2)
    return (w1, b1, w2, b2, w3, b3)


def reference_forward(x, params):
    """Pure-JAX reference with matching bf16-operand / f32-accumulate math."""
    w1, b1, w2, b2, w3, b3 = params
    xb = x.astype(jnp.bfloat16)
    h1 = jnp.maximum(
        jnp.dot(xb, w1.astype(jnp.bfloat16),
                preferred_element_type=jnp.float32) + b1, 0.0)
    h2 = jnp.maximum(
        jnp.dot(h1.astype(jnp.bfloat16), w2.astype(jnp.bfloat16),
                preferred_element_type=jnp.float32) + b2, 0.0)
    return jnp.dot(h2.astype(jnp.bfloat16), w3.astype(jnp.bfloat16),
                   preferred_element_type=jnp.float32) + b3


if __name__ == "__main__":
    key = jax.random.PRNGKey(0)
    k_x, k_x2, k_p = jax.random.split(key, 3)

    input_size = 16
    params = init_params(k_p, input_size)
    prepared = prepare_params(params)

    # Small-batch check (single-block path).
    batch = 8
    x = jax.random.normal(k_x, (batch, input_size), jnp.float32)
    out = jax.block_until_ready(net_forward(x, prepared))
    ref = reference_forward(x, params)
    assert out.shape == (batch, 2)
    assert jnp.allclose(out, ref, atol=2e-2, rtol=2e-2)

    # Multi-block check (exercises >=2 grid steps and boundary-block masking).
    batch2 = 300
    x2 = jax.random.normal(k_x2, (batch2, input_size), jnp.float32)
    out2 = jax.block_until_ready(net_forward(x2, prepared))
    ref2 = reference_forward(x2, params)
    assert out2.shape == (batch2, 2)
    assert jnp.allclose(out2, ref2, atol=2e-2, rtol=2e-2)

    print("KERNEL_OK")
</pallas_src>

<mosaic_0001>
module attributes {stable_mosaic.version = 11 : i64} {
  func.func @mlp_kernel(%arg0: i32, %arg1: memref<8x16xf32, #tpu.memory_space<vmem>>, %arg2: memref<16x128xbf16, #tpu.memory_space<vmem>>, %arg3: memref<1x128xf32, #tpu.memory_space<vmem>>, %arg4: memref<128x64xbf16, #tpu.memory_space<vmem>>, %arg5: memref<1x64xf32, #tpu.memory_space<vmem>>, %arg6: memref<64x2xbf16, #tpu.memory_space<vmem>>, %arg7: memref<1x2xf32, #tpu.memory_space<vmem>>, %arg8: memref<8x2xf32, #tpu.memory_space<vmem>>) attributes {dimension_semantics = [#tpu.dimension_semantics<parallel>], iteration_bounds = array<i64: 1>, scalar_prefetch = 0 : i64, scratch_operands = 0 : i64, tpu.core_type = #tpu.core_type<tc>, window_params = [{transform_indices = @transform_0, window_bounds = array<i64: 8, 16>}, {pipeline_mode = #tpu.pipeline_mode<synchronous>, transform_indices = @transform_1, window_bounds = array<i64: 16, 128>}, {pipeline_mode = #tpu.pipeline_mode<synchronous>, transform_indices = @transform_2, window_bounds = array<i64: 1, 128>}, {pipeline_mode = #tpu.pipeline_mode<synchronous>, transform_indices = @transform_3, window_bounds = array<i64: 128, 64>}, {pipeline_mode = #tpu.pipeline_mode<synchronous>, transform_indices = @transform_4, window_bounds = array<i64: 1, 64>}, {pipeline_mode = #tpu.pipeline_mode<synchronous>, transform_indices = @transform_5, window_bounds = array<i64: 64, 2>}, {pipeline_mode = #tpu.pipeline_mode<synchronous>, transform_indices = @transform_6, window_bounds = array<i64: 1, 2>}, {transform_indices = @transform_7, window_bounds = array<i64: 8, 2>}]} {
    %c0 = arith.constant 0 : index
    %c0_0 = arith.constant 0 : index
    %0 = vector.load %arg1[%c0, %c0_0] : memref<8x16xf32, #tpu.memory_space<vmem>>, vector<8x16xf32>
    %1 = arith.truncf %0 : vector<8x16xf32> to vector<8x16xbf16>
    %c0_1 = arith.constant 0 : index
    %c0_2 = arith.constant 0 : index
    %2 = vector.load %arg2[%c0_1, %c0_2] : memref<16x128xbf16, #tpu.memory_space<vmem>>, vector<16x128xbf16>
    %cst = arith.constant dense<0.000000e+00> : vector<8x128xf32>
    %3 = tpu.matmul %1, %2, %cst {dimension_numbers = #tpu.dot_dimension_numbers<[1], [0], [0], [1], [0, 0, 1, 1], [], []>} : vector<8x16xbf16>, vector<16x128xbf16>, vector<8x128xf32> -> vector<8x128xf32>
    %c0_3 = arith.constant 0 : index
    %c0_4 = arith.constant 0 : index
    %4 = vector.load %arg3[%c0_3, %c0_4] : memref<1x128xf32, #tpu.memory_space<vmem>>, vector<1x128xf32>
    %5 = vector.broadcast %4 : vector<1x128xf32> to vector<8x128xf32>
    %6 = arith.addf %3, %5 : vector<8x128xf32>
    %cst_5 = arith.constant 0.000000e+00 : f32
    %7 = vector.broadcast %cst_5 : f32 to vector<8x128xf32>
    %8 = arith.maximumf %6, %7 : vector<8x128xf32>
    %9 = arith.truncf %8 : vector<8x128xf32> to vector<8x128xbf16>
    %c0_6 = arith.constant 0 : index
    %c0_7 = arith.constant 0 : index
    %10 = vector.load %arg4[%c0_6, %c0_7] : memref<128x64xbf16, #tpu.memory_space<vmem>>, vector<128x64xbf16>
    %cst_8 = arith.constant dense<0.000000e+00> : vector<8x64xf32>
    %11 = tpu.matmul %9, %10, %cst_8 {dimension_numbers = #tpu.dot_dimension_numbers<[1], [0], [0], [1], [0, 0, 1, 1], [], []>} : vector<8x128xbf16>, vector<128x64xbf16>, vector<8x64xf32> -> vector<8x64xf32>
    %c0_9 = arith.constant 0 : index
    %c0_10 = arith.constant 0 : index
    %12 = vector.load %arg5[%c0_9, %c0_10] : memref<1x64xf32, #tpu.memory_space<vmem>>, vector<1x64xf32>
    %13 = vector.broadcast %12 : vector<1x64xf32> to vector<8x64xf32>
    %14 = arith.addf %11, %13 : vector<8x64xf32>
    %cst_11 = arith.constant 0.000000e+00 : f32
    %15 = vector.broadcast %cst_11 : f32 to vector<8x64xf32>
    %16 = arith.maximumf %14, %15 : vector<8x64xf32>
    %17 = arith.truncf %16 : vector<8x64xf32> to vector<8x64xbf16>
    %c0_12 = arith.constant 0 : index
    %c0_13 = arith.constant 0 : index
    %18 = vector.load %arg6[%c0_12, %c0_13] : memref<64x2xbf16, #tpu.memory_space<vmem>>, vector<64x2xbf16>
    %cst_14 = arith.constant dense<0.000000e+00> : vector<8x2xf32>
    %19 = tpu.matmul %17, %18, %cst_14 {dimension_numbers = #tpu.dot_dimension_numbers<[1], [0], [0], [1], [0, 0, 1, 1], [], []>} : vector<8x64xbf16>, vector<64x2xbf16>, vector<8x2xf32> -> vector<8x2xf32>
    %c0_15 = arith.constant 0 : index
    %c0_16 = arith.constant 0 : index
    %20 = vector.load %arg7[%c0_15, %c0_16] : memref<1x2xf32, #tpu.memory_space<vmem>>, vector<1x2xf32>
    %21 = vector.broadcast %20 : vector<1x2xf32> to vector<8x2xf32>
    %22 = arith.addf %19, %21 : vector<8x2xf32>
    %c0_17 = arith.constant 0 : index
    %c0_18 = arith.constant 0 : index
    %23 = vector.load %arg8[%c0_17, %c0_18] : memref<8x2xf32, #tpu.memory_space<vmem>>, vector<8x2xf32>
    tpu.vector_store %arg8[%c0_17, %c0_18], %22 {strides = array<i32>} : memref<8x2xf32, #tpu.memory_space<vmem>>, vector<8x2xf32>,
    return
  }
  func.func @transform_0(%arg0: i32) -> (i32, i32) {
    %c0_i32 = arith.constant 0 : i32
    %c0_i32_0 = arith.constant 0 : i32
    return %arg0, %c0_i32 : i32, i32
  }
  func.func @transform_1(%arg0: i32) -> (i32, i32) {
    %c0_i32 = arith.constant 0 : i32
    %c0_i32_0 = arith.constant 0 : i32
    %c0_i32_1 = arith.constant 0 : i32
    return %c0_i32, %c0_i32_0 : i32, i32
  }
  func.func @transform_2(%arg0: i32) -> (i32, i32) {
    %c0_i32 = arith.constant 0 : i32
    %c0_i32_0 = arith.constant 0 : i32
    %c0_i32_1 = arith.constant 0 : i32
    return %c0_i32, %c0_i32_0 : i32, i32
  }
  func.func @transform_3(%arg0: i32) -> (i32, i32) {
    %c0_i32 = arith.constant 0 : i32
    %c0_i32_0 = arith.constant 0 : i32
    %c0_i32_1 = arith.constant 0 : i32
    return %c0_i32, %c0_i32_0 : i32, i32
  }
  func.func @transform_4(%arg0: i32) -> (i32, i32) {
    %c0_i32 = arith.constant 0 : i32
    %c0_i32_0 = arith.constant 0 : i32
    %c0_i32_1 = arith.constant 0 : i32
    return %c0_i32, %c0_i32_0 : i32, i32
  }
  func.func @transform_5(%arg0: i32) -> (i32, i32) {
    %c0_i32 = arith.constant 0 : i32
    %c0_i32_0 = arith.constant 0 : i32
    %c0_i32_1 = arith.constant 0 : i32
    return %c0_i32, %c0_i32_0 : i32, i32
  }
  func.func @transform_6(%arg0: i32) -> (i32, i32) {
    %c0_i32 = arith.constant 0 : i32
    %c0_i32_0 = arith.constant 0 : i32
    %c0_i32_1 = arith.constant 0 : i32
    return %c0_i32, %c0_i32_0 : i32, i32
  }
  func.func @transform_7(%arg0: i32) -> (i32, i32) {
    %c0_i32 = arith.constant 0 : i32
    %c0_i32_0 = arith.constant 0 : i32
    return %arg0, %c0_i32 : i32, i32
  }
}

</mosaic_0001>

<bundles_post_ra>
// kernel: tpu_custom_call.1
= control target key start
LH: loop header
LB: loop body
LE: loop exit
PB: predicated region body
PF: predicated region fallthrough
CT: control target
= control target key end

     0   :  { %v379_v0 = vmov 0.0   ;;  %vm380_vm0 = vmmov 0   ;;  %vm44_vm1 = vcmask 130048   ;;  %vm242_vm2 = vcmask 523264   ;;  %s475_s1 = inlined_call_operand.vmem [shape: bf16[16,128], index: 1, kind: input, shape index: {}]   ;;  %s476_s0 = inlined_call_operand.vmem [shape: f32[8,16], index: 0, kind: input, shape index: {}]   ;;  %s477_s3 = inlined_call_operand.vmem [shape: bf16[128,64], index: 3, kind: input, shape index: {}]   ;;  %s478_s5 = inlined_call_operand.vmem [shape: bf16[64,2], index: 5, kind: input, shape index: {}]   ;;  %s479_s2 = inlined_call_operand.vmem [shape: f32[1,128], index: 2, kind: input, shape index: {}]   ;;  %s480_s4 = inlined_call_operand.vmem [shape: f32[1,64], index: 4, kind: input, shape index: {}]   ;;  %s481_s6 = inlined_call_operand.vmem [shape: f32[1,2], index: 6, kind: input, shape index: {}]   ;;  %s482_s7 = inlined_call_operand.vmem [shape: f32[8,2], index: 7, kind: output, shape index: {}]  }
   0x1   :  { %326 = vmatprep.subr.bf16.mxu0 %v379_v0  ;;  %v366_v1 = vld [vmem:[%s475_s1] sm:$0xff]   ;;  %328 = vmatprep.mubr.msk.bf16.mxu0 %vm380_vm0, %v379_v0  ;;  %v368_v5 = vld [vmem:[%s477_s3 + $0x8] sm:$0xff]   ;;  %v369_v6 = vld [vmem:[%s477_s3 + $0x10] sm:$0xff]   ;;  %vm286_vm3 = vcmask 15360  }
   0x2   :  { %v27_v2 = vld [vmem:[%s476_s0] sm:$0xff]  ;;  %332 = vmatprep.subr.bf16.mxu1 %v379_v0  ;;  %348 = vmatprep.mubr.msk.bf16.mxu1 %vm380_vm0, %v379_v0  ;;  %v370_v7 = vld [vmem:[%s477_s3 + $0x18] sm:$0xff]   ;;  %v372_v9 = vld [vmem:[%s477_s3 + $0x28] sm:$0xff]  }
   0x3   :  { %327 = vmatpush3.bf16.msra.mxu0 %v366_v1  ;;  %v28_v3 = vpack.c.bf16 %v27_v2, %v27_v2  ;;  %v367_v4 = vld [vmem:[%s477_s3] sm:$0xff]   ;;  %v373_v10 = vld [vmem:[%s477_s3 + $0x30] sm:$0xff]   ;;  %v374_v11 = vld [vmem:[%s477_s3 + $0x38] sm:$0xff]  }
   0x4   :  { %352 = vmatprep.subr.bf16.mxu0 %v379_v0  ;;  %333 = vmatpush3.bf16.msra.mxu1 %v367_v4  ;;  %v371_v8 = vld [vmem:[%s477_s3 + $0x20] sm:$0xff]   ;;  %v376_v13 = vld [vmem:[%s478_s5 + $0x8] sm:$0xff]   ;;  %v377_v22 = vld [vmem:[%s478_s5 + $0x10] sm:$0xff]  }
   0x5   :  { %334 = vmatprep.subr.bf16.mxu1 %v379_v0  ;;  %v375_v12 = vld [vmem:[%s478_s5] sm:$0xff]   ;;  %v378_v23 = vld [vmem:[%s478_s5 + $0x18] sm:$0xff]  }
   0x6   :  { %329 = vmatmul.mubr.msk.bf16.vlgmr.msra.gmra.mrb[0].mxu0 %vm44_vm1, %v28_v3  ;;  %v292_v14 = vld [vmem:[%s479_s2] ss:$0 sm:$0xff] }
   0x7   :  { %360 = vmatprep.mubr.msk.bf16.mxu0 %vm380_vm0, %v379_v0  ;;  %353 = vmatpush3.bf16.msra.mxu0 %v375_v12  ;;  %v295_v24 = vld [vmem:[%s480_s4] ss:$0 sm:$0xff] }
   0x8   :  { %335 = vmatpush3.bf16.msra.mxu1 %v368_v5  ;;  %354 = vmatprep.subr.bf16.mxu0 %v379_v0  ;;  %v304_v32 = vld [vmem:[%s481_s6] ss:$0 sm:$0xff] }
   0x9   :  { %336 = vmatprep.subr.bf16.mxu1 %v379_v0 }
   0xb   :  { %355 = vmatpush3.bf16.msra.mxu0 %v376_v13 }
   0xc   :  { %337 = vmatpush3.bf16.msra.mxu1 %v369_v6  ;;  %356 = vmatprep.subr.bf16.mxu0 %v379_v0 }
   0xd   :  { %338 = vmatprep.subr.bf16.mxu1 %v379_v0 }
   0xf   :  { %357 = vmatpush3.bf16.msra.mxu0 %v377_v22 }
  0x10   :  { %339 = vmatpush3.bf16.msra.mxu1 %v370_v7  ;;  %358 = vmatprep.subr.bf16.mxu0 %v379_v0 }
  0x11   :  { %340 = vmatprep.subr.bf16.mxu1 %v379_v0 }
  0x13   :  { %359 = vmatpush3.bf16.msra.mxu0 %v378_v23 }
  0x14   :  { %341 = vmatpush3.bf16.msra.mxu1 %v371_v8 }
  0x15   :  { %342 = vmatprep.subr.bf16.mxu1 %v379_v0 }
  0x18   :  { %343 = vmatpush3.bf16.msra.mxu1 %v372_v9 }
  0x19   :  { %344 = vmatprep.subr.bf16.mxu1 %v379_v0 }
  0x1c   :  { %345 = vmatpush3.bf16.msra.mxu1 %v373_v10 }
  0x1d   :  { %346 = vmatprep.subr.bf16.mxu1 %v379_v0 }
  0x20   :  { %347 = vmatpush3.bf16.msra.mxu1 %v374_v11 }
  0xd9   :  { %v82_v15 = vpop.f32.mrb[0].mxu0 }
  0xda   :  { %v83_v16 = vadd.f32 %v292_v14, %v82_v15  ;;  %v330_v17 = vpop.f32.mrb[1].mxu0 }
  0xdb   :  { %v85_v18 = vpop.f32.mrb[2].mxu0 }
  0xdc   :  { %v88_v19 = vmax.f32 %v83_v16, 0.0  ;;  %v331_v20 = vpop.f32.mrb[3].mxu0 }
  0xde   :  { %v89_v21 = vpack.c.bf16 %v88_v19, %v88_v19 }
  0xe0   :  { %349 = vmatmul.mubr.bf16.vlgmr.msra.gmra.mrb[0].mxu1 %v89_v21 }
 0x1b3   :  { %v195_v25 = vpop.f32.mrb[0].mxu1 }
 0x1b4   :  { %v196_v26 = vadd.f32 %v295_v24, %v195_v25  ;;  %v350_v27 = vpop.f32.mrb[1].mxu1 }
 0x1b5   :  { %v198_v28 = vpop.f32.mrb[2].mxu1 }
 0x1b6   :  { %v201_v29 = vmax.f32 %v196_v26, 0.0  ;;  %v351_v30 = vpop.f32.mrb[3].mxu1 }
 0x1b8   :  { %v202_v31 = vpack.c.bf16 %v201_v29, %v201_v29 }
 0x1ba   :  { %361 = vmatmul.mubr.msk.bf16.vlgmr.msra.gmra.mrb[4].mxu0 %vm242_vm2, %v202_v31 }
 0x28d   :  { %v280_v33 = vpop.f32.mrb[4].mxu0 }
 0x28e   :  { %v281_v34 = vadd.f32 %v304_v32, %v280_v33  ;;  %v362_v35 = vpop.f32.mrb[5].mxu0 }
 0x28f   :  { %v283_v36 = vpop.f32.mrb[6].mxu0 }
 0x290   :  { %287 = vst.msk [vmem:[%s482_s7] sm:$0xff] %vm286_vm3, %v281_v34  ;;  %v363_v37 = vpop.f32.mrb[7].mxu0 }

</bundles_post_ra>
